<compile_context>
chip_gen: v7x
topology: tpu7x:2x2x1
jax: 0.10.0
libtpu: 0.0.40
codegen_flags: <defaults>
</compile_context>

<pallas_src>
import functools

import jax
import jax.numpy as jnp
from jax.experimental import pallas as pl
from jax.experimental.pallas import tpu as pltpu

LAYER_SIZES = [784, 12, 10]

SUBLANE = 8
LANE = 128
D_PAD = 896    # 784 padded to 7*128
H_PAD = 128    # 12  padded to 128
O_PAD = 128    # 10  padded to 128


def _round_up(v, m):
    return ((v + m - 1) // m) * m


def mlp_kernel(x_ref, w1_ref, b1_ref, w2_ref, b2_ref, o_ref):
    # x: (TB, 896) bf16 ; w1: (896, 128) bf16 ; w2: (128, 128) bf16 ; biases f32.
    x = x_ref[...]
    h = jnp.dot(x, w1_ref[...], preferred_element_type=jnp.float32)   # (TB, 128) f32
    h = jnp.maximum(h + b1_ref[...], 0.0)                             # bias + relu in f32
    y = jnp.dot(h.astype(jnp.bfloat16), w2_ref[...],
                preferred_element_type=jnp.float32)                   # (TB, 128) f32
    o_ref[...] = (y + b2_ref[...]).astype(o_ref.dtype)


def prep_params(w1_pt, b1_pt, w2_pt, b2_pt):
    """PyTorch layout (out,in) -> kernel layout: transpose to (in,out),
    zero-pad to lane multiples, cast matmul operands to bf16 (biases stay f32)."""
    w1 = jnp.zeros((D_PAD, H_PAD), jnp.float32).at[:784, :12].set(w1_pt.T)
    b1 = jnp.zeros((1, H_PAD), jnp.float32).at[0, :12].set(b1_pt)
    w2 = jnp.zeros((H_PAD, O_PAD), jnp.float32).at[:12, :10].set(w2_pt.T)
    b2 = jnp.zeros((1, O_PAD), jnp.float32).at[0, :10].set(b2_pt)
    return (w1.astype(jnp.bfloat16), b1, w2.astype(jnp.bfloat16), b2)


@functools.partial(jax.jit, static_argnames=("tile_b",))
def net_forward(x, w1, b1, w2, b2, tile_b=512):
    """x: (B, 784) f32; padded/bf16 params from prep_params(). Returns (B, 10) f32."""
    B, D = x.shape
    # Row tile: large enough to amortize ~0.35us/step overhead, small enough
    # that double-buffered (TB, 896) bf16 tiles fit easily in v7x's 64 MiB VMEM.
    tb = min(tile_b, _round_up(B, SUBLANE))
    b_pad = _round_up(B, tb)

    # Pad batch + feature dims; stream the activation as bf16 (dominant HBM read).
    x_p = jnp.zeros((b_pad, D_PAD), jnp.bfloat16).at[:B, :D].set(x.astype(jnp.bfloat16))

    grid = (b_pad // tb,)
    flops = 2 * b_pad * (D_PAD * H_PAD + H_PAD * O_PAD)
    bytes_accessed = (x_p.size * 2 + w1.size * 2 + w2.size * 2
                      + (b1.size + b2.size) * 4 + b_pad * O_PAD * 4)

    out = pl.pallas_call(
        mlp_kernel,
        out_shape=jax.ShapeDtypeStruct((b_pad, O_PAD), jnp.float32),
        grid=grid,
        in_specs=[
            pl.BlockSpec((tb, D_PAD), lambda i: (i, 0)),      # streamed activation rows
            pl.BlockSpec((D_PAD, H_PAD), lambda i: (0, 0)),   # W1 pinned in VMEM
            pl.BlockSpec((1, H_PAD), lambda i: (0, 0)),       # b1 pinned
            pl.BlockSpec((H_PAD, O_PAD), lambda i: (0, 0)),   # W2 pinned
            pl.BlockSpec((1, O_PAD), lambda i: (0, 0)),       # b2 pinned
        ],
        out_specs=pl.BlockSpec((tb, O_PAD), lambda i: (i, 0)),
        compiler_params=pltpu.CompilerParams(
            dimension_semantics=("parallel",),
            vmem_limit_bytes=32 * 1024 * 1024,
        ),
        cost_estimate=pl.CostEstimate(
            flops=flops, transcendentals=0, bytes_accessed=bytes_accessed),
    )(x_p, w1, b1, w2, b2)

    return out[:B, :LAYER_SIZES[2]]


def init_params(key, layer_sizes, std=0.05):
    """Deterministic init mirroring `torch.randn(W.shape) * std_weight_dict[name]`
    with PyTorch nn.Linear layout (out_features, in_features)."""
    k1, k2, k3, k4 = jax.random.split(key, 4)
    w1_pt = jax.random.normal(k1, (layer_sizes[1], layer_sizes[0]), jnp.float32) * std
    b1_pt = jax.random.normal(k2, (layer_sizes[1],), jnp.float32) * std
    w2_pt = jax.random.normal(k3, (layer_sizes[2], layer_sizes[1]), jnp.float32) * std
    b2_pt = jax.random.normal(k4, (layer_sizes[2],), jnp.float32) * std
    return w1_pt, b1_pt, w2_pt, b2_pt


def net_forward_ref(x, w1_pt, b1_pt, w2_pt, b2_pt):
    h = jnp.maximum(x @ w1_pt.T + b1_pt, 0.0)
    return h @ w2_pt.T + b2_pt


if __name__ == "__main__":
    key = jax.random.PRNGKey(0)
    kx, kx2, kp = jax.random.split(key, 3)

    w1_pt, b1_pt, w2_pt, b2_pt = init_params(kp, LAYER_SIZES)
    w1, b1, w2, b2 = prep_params(w1_pt, b1_pt, w2_pt, b2_pt)

    # Small-batch run (single grid step).
    batch = 8
    x = jax.random.normal(kx, (batch, LAYER_SIZES[0]), jnp.float32)
    out = jax.block_until_ready(net_forward(x, w1, b1, w2, b2))
    ref = net_forward_ref(x, w1_pt, b1_pt, w2_pt, b2_pt)
    assert out.shape == (batch, LAYER_SIZES[2])
    # bf16 matmul inputs -> looser tolerance than pure f32.
    assert jnp.allclose(out, ref, atol=3e-2, rtol=3e-2), float(jnp.max(jnp.abs(out - ref)))

    # Larger, non-tile-aligned batch to exercise the row-tiled grid + padding path.
    batch2 = 300
    x2 = jax.random.normal(kx2, (batch2, LAYER_SIZES[0]), jnp.float32)
    out2 = jax.block_until_ready(net_forward(x2, w1, b1, w2, b2, tile_b=128))
    ref2 = net_forward_ref(x2, w1_pt, b1_pt, w2_pt, b2_pt)
    assert out2.shape == (batch2, LAYER_SIZES[2])
    assert jnp.allclose(out2, ref2, atol=3e-2, rtol=3e-2), float(jnp.max(jnp.abs(out2 - ref2)))

    print("KERNEL_OK")
</pallas_src>

<mosaic_0001>
module attributes {stable_mosaic.version = 11 : i64} {
  func.func @mlp_kernel(%arg0: i32, %arg1: memref<8x896xbf16, #tpu.memory_space<vmem>>, %arg2: memref<896x128xbf16, #tpu.memory_space<vmem>>, %arg3: memref<1x128xf32, #tpu.memory_space<vmem>>, %arg4: memref<128x128xbf16, #tpu.memory_space<vmem>>, %arg5: memref<1x128xf32, #tpu.memory_space<vmem>>, %arg6: memref<8x128xf32, #tpu.memory_space<vmem>>) attributes {dimension_semantics = [#tpu.dimension_semantics<parallel>], iteration_bounds = array<i64: 1>, scalar_prefetch = 0 : i64, scratch_operands = 0 : i64, tpu.core_type = #tpu.core_type<tc>, window_params = [{transform_indices = @transform_0, window_bounds = array<i64: 8, 896>}, {pipeline_mode = #tpu.pipeline_mode<synchronous>, transform_indices = @transform_1, window_bounds = array<i64: 896, 128>}, {pipeline_mode = #tpu.pipeline_mode<synchronous>, transform_indices = @transform_2, window_bounds = array<i64: 1, 128>}, {pipeline_mode = #tpu.pipeline_mode<synchronous>, transform_indices = @transform_3, window_bounds = array<i64: 128, 128>}, {pipeline_mode = #tpu.pipeline_mode<synchronous>, transform_indices = @transform_4, window_bounds = array<i64: 1, 128>}, {transform_indices = @transform_5, window_bounds = array<i64: 8, 128>}]} {
    %c0 = arith.constant 0 : index
    %c0_0 = arith.constant 0 : index
    %0 = vector.load %arg1[%c0, %c0_0] : memref<8x896xbf16, #tpu.memory_space<vmem>>, vector<8x896xbf16>
    %c0_1 = arith.constant 0 : index
    %c0_2 = arith.constant 0 : index
    %1 = vector.load %arg2[%c0_1, %c0_2] : memref<896x128xbf16, #tpu.memory_space<vmem>>, vector<896x128xbf16>
    %cst = arith.constant dense<0.000000e+00> : vector<8x128xf32>
    %2 = tpu.matmul %0, %1, %cst {dimension_numbers = #tpu.dot_dimension_numbers<[1], [0], [0], [1], [0, 0, 1, 1], [], []>} : vector<8x896xbf16>, vector<896x128xbf16>, vector<8x128xf32> -> vector<8x128xf32>
    %c0_3 = arith.constant 0 : index
    %c0_4 = arith.constant 0 : index
    %3 = vector.load %arg3[%c0_3, %c0_4] : memref<1x128xf32, #tpu.memory_space<vmem>>, vector<1x128xf32>
    %4 = vector.broadcast %3 : vector<1x128xf32> to vector<8x128xf32>
    %5 = arith.addf %2, %4 : vector<8x128xf32>
    %cst_5 = arith.constant 0.000000e+00 : f32
    %6 = vector.broadcast %cst_5 : f32 to vector<8x128xf32>
    %7 = arith.maximumf %5, %6 : vector<8x128xf32>
    %8 = arith.truncf %7 : vector<8x128xf32> to vector<8x128xbf16>
    %c0_6 = arith.constant 0 : index
    %c0_7 = arith.constant 0 : index
    %9 = vector.load %arg4[%c0_6, %c0_7] : memref<128x128xbf16, #tpu.memory_space<vmem>>, vector<128x128xbf16>
    %cst_8 = arith.constant dense<0.000000e+00> : vector<8x128xf32>
    %10 = tpu.matmul %8, %9, %cst_8 {dimension_numbers = #tpu.dot_dimension_numbers<[1], [0], [0], [1], [0, 0, 1, 1], [], []>} : vector<8x128xbf16>, vector<128x128xbf16>, vector<8x128xf32> -> vector<8x128xf32>
    %c0_9 = arith.constant 0 : index
    %c0_10 = arith.constant 0 : index
    %11 = vector.load %arg5[%c0_9, %c0_10] : memref<1x128xf32, #tpu.memory_space<vmem>>, vector<1x128xf32>
    %12 = vector.broadcast %11 : vector<1x128xf32> to vector<8x128xf32>
    %13 = arith.addf %10, %12 : vector<8x128xf32>
    %c0_11 = arith.constant 0 : index
    %c0_12 = arith.constant 0 : index
    %14 = vector.load %arg6[%c0_11, %c0_12] : memref<8x128xf32, #tpu.memory_space<vmem>>, vector<8x128xf32>
    tpu.vector_store %arg6[%c0_11, %c0_12], %13 {strides = array<i32>} : memref<8x128xf32, #tpu.memory_space<vmem>>, vector<8x128xf32>,
    return
  }
  func.func @transform_0(%arg0: i32) -> (i32, i32) {
    %c0_i32 = arith.constant 0 : i32
    %c0_i32_0 = arith.constant 0 : i32
    return %arg0, %c0_i32 : i32, i32
  }
  func.func @transform_1(%arg0: i32) -> (i32, i32) {
    %c0_i32 = arith.constant 0 : i32
    %c0_i32_0 = arith.constant 0 : i32
    %c0_i32_1 = arith.constant 0 : i32
    return %c0_i32, %c0_i32_0 : i32, i32
  }
  func.func @transform_2(%arg0: i32) -> (i32, i32) {
    %c0_i32 = arith.constant 0 : i32
    %c0_i32_0 = arith.constant 0 : i32
    %c0_i32_1 = arith.constant 0 : i32
    return %c0_i32, %c0_i32_0 : i32, i32
  }
  func.func @transform_3(%arg0: i32) -> (i32, i32) {
    %c0_i32 = arith.constant 0 : i32
    %c0_i32_0 = arith.constant 0 : i32
    %c0_i32_1 = arith.constant 0 : i32
    return %c0_i32, %c0_i32_0 : i32, i32
  }
  func.func @transform_4(%arg0: i32) -> (i32, i32) {
    %c0_i32 = arith.constant 0 : i32
    %c0_i32_0 = arith.constant 0 : i32
    %c0_i32_1 = arith.constant 0 : i32
    return %c0_i32, %c0_i32_0 : i32, i32
  }
  func.func @transform_5(%arg0: i32) -> (i32, i32) {
    %c0_i32 = arith.constant 0 : i32
    %c0_i32_0 = arith.constant 0 : i32
    return %arg0, %c0_i32 : i32, i32
  }
}

</mosaic_0001>

<bundles_post_ra>
// kernel: net_forward.1
= control target key start
LH: loop header
LB: loop body
LE: loop exit
PB: predicated region body
PF: predicated region fallthrough
CT: control target
= control target key end

     0   :  { %10 = vsyncpa [#allocation3], 0  ;;  %s1253_s0 = inlined_call_operand.vmem [shape: bf16[8,896], index: 0, kind: input, shape index: {}]   ;;  %s1254_s1 = inlined_call_operand.hbm [shape: bf16[896,128], index: 1, kind: input, shape index: {}]   ;;  %s1255_s2 = inlined_call_operand.vmem [shape: f32[1,128], index: 2, kind: input, shape index: {}]   ;;  %s1256_s3 = inlined_call_operand.vmem [shape: bf16[128,128], index: 3, kind: input, shape index: {}]   ;;  %s1257_s4 = inlined_call_operand.vmem [shape: f32[1,128], index: 4, kind: input, shape index: {}]   ;;  %s1258_s5 = inlined_call_operand.hbm [shape: f32[8,128], index: 5, kind: output, shape index: {}]  }
   0x1   :  { %11 = vsyncpa [#allocation4], 0  ;;  %s1131_s18 = smov [#allocation2]   ;;  %s1083_s22 = scalar_lea.hbm %s1254_s1, 7168 }
   0x2   :  { %s19_s19 = sshll.u32 %s1131_s18, 4  ;;  %p1084_p0 = scmp.ne.s32.totalorder %s1254_s1, %s1083_s22  ;;  %s20_s19 = int_to_ptr.vmem [resolvable:$true] %s19_s19 }
   0x3   :  { %p1087_p1 = scmp.lt.u32.totalorder %s1083_s22, %s1254_s1 }
   0x5   :  { %p1089_p2 = pnand %p1087_p1, %p1084_p0 }
   0x7   :  { %1092 = shalt.err (!%p1089_p2)
}
   0x8   :  { %s1093_s27 = scalar_lea.vmem %s20_s19, 7168  ;;  %p1098_p4 = scmp.lt.s32.totalorder %s20_s19, %s20_s19 }
   0x9   :  { %p1094_p3 = scmp.ne.s32.totalorder %s20_s19, %s1093_s27  ;;  %p1099_p5 = scmp.lt.s32.totalorder %s1093_s27, %s1093_s27 }
   0xb   :  { %p1100_p6 = por %p1099_p5, %p1098_p4 }
   0xd   :  { %p1101_p7 = pnand %p1100_p6, %p1094_p3 }
   0xf   :  { %1104 = shalt.err (!%p1101_p7)
}
  0x10   :  { %s1132_s28 = smov 64   ;;  %s1133_s29 = smov 4  }
  0x11   :  { %25 = dma.hbm_to_vmem [thread:$0]  %s1254_s1, 7168, %s20_s19, [#allocation3], %s1132_s28, %s1132_s28, %s1133_s29  }
  0x12   :  { %1127 = dma.done.wait [#allocation3], 7168  }
  0x13   :  { %1128 = vsyncadd [#allocation3], 4294960128  ;;  %v1012_v0 = vld [vmem:[#allocation2 + $0x40] sm:$0xff]   ;;  %v1016_v4 = vld [vmem:[#allocation2 + $0x48] sm:$0xff]   ;;  %v1134_v42 = vmov 0.0   ;;  %vm1135_vm0 = vmmov 0  }
  0x14   :  { %v1013_v1 = vld [vmem:[#allocation2] sm:$0xff]   ;;  %882 = vmatprep.subr.bf16.mxu0 %v1012_v0  ;;  %v1017_v5 = vld [vmem:[#allocation2 + $0x8] sm:$0xff]   ;;  %v1020_v8 = vld [vmem:[#allocation2 + $0x50] sm:$0xff]   ;;  %s1136_s6 = smov [#allocation5]  }
  0x15   :  { %v1014_v2 = vld [vmem:[#allocation2 + $0xc0] sm:$0xff]   ;;  %883 = vmatpush3.bf16.msra.mxu0 %v1013_v1  ;;  %v1018_v6 = vld [vmem:[#allocation2 + $0xc8] sm:$0xff]   ;;  %v1021_v9 = vld [vmem:[#allocation2 + $0x10] sm:$0xff]   ;;  %s800_s1 = sshll.u32 %s1136_s6, 4  ;;  %s801_s1 = int_to_ptr.vmem [resolvable:$true] %s800_s1 }
  0x16   :  { %v1015_v3 = vld [vmem:[#allocation2 + $0x80] sm:$0xff]   ;;  %904 = vmatprep.subr.bf16.mxu1 %v1014_v2  ;;  %884 = vmatprep.subr.bf16.mxu0 %v1016_v4  ;;  %v1019_v7 = vld [vmem:[#allocation2 + $0x88] sm:$0xff]   ;;  %v1022_v10 = vld [vmem:[#allocation2 + $0xd0] sm:$0xff]   ;;  %s1105_s7 = scalar_lea.vmem %s801_s1, 128  ;;  %p1110_p9 = scmp.lt.s32.totalorder %s801_s1, %s801_s1 }
  0x17   :  { %905 = vmatpush3.bf16.msra.mxu1 %v1015_v3  ;;  %v1023_v11 = vld [vmem:[#allocation2 + $0x90] sm:$0xff]   ;;  %v1024_v12 = vld [vmem:[#allocation2 + $0x58] sm:$0xff]   ;;  %v1028_v16 = vld [vmem:[#allocation2 + $0x60] sm:$0xff]   ;;  %p1106_p8 = scmp.ne.s32.totalorder %s801_s1, %s1105_s7  ;;  %p1111_p10 = scmp.lt.s32.totalorder %s1105_s7, %s1105_s7 }
  0x18   :  { %906 = vmatprep.subr.bf16.mxu1 %v1018_v6  ;;  %v1025_v13 = vld [vmem:[#allocation2 + $0x18] sm:$0xff]   ;;  %v1029_v17 = vld [vmem:[#allocation2 + $0x20] sm:$0xff]   ;;  %v1032_v20 = vld [vmem:[#allocation2 + $0x68] sm:$0xff]  }
  0x19   :  { %885 = vmatpush3.bf16.msra.mxu0 %v1017_v5  ;;  %v1026_v14 = vld [vmem:[#allocation2 + $0xd8] sm:$0xff]   ;;  %v1030_v18 = vld [vmem:[#allocation2 + $0xe0] sm:$0xff]   ;;  %v1033_v21 = vld [vmem:[#allocation2 + $0x28] sm:$0xff]   ;;  %p1112_p11 = por %p1111_p10, %p1110_p9 }
  0x1a   :  { %886 = vmatprep.subr.bf16.mxu0 %v1020_v8  ;;  %v1027_v15 = vld [vmem:[#allocation2 + $0x98] sm:$0xff]   ;;  %v1031_v19 = vld [vmem:[#allocation2 + $0xa0] sm:$0xff]   ;;  %v1034_v22 = vld [vmem:[#allocation2 + $0xe8] sm:$0xff]  }
  0x1b   :  { %907 = vmatpush3.bf16.msra.mxu1 %v1019_v7  ;;  %v1035_v23 = vld [vmem:[#allocation2 + $0xa8] sm:$0xff]   ;;  %v1036_v24 = vld [vmem:[#allocation2 + $0x70] sm:$0xff]   ;;  %v1040_v28 = vld [vmem:[#allocation2 + $0x78] sm:$0xff]   ;;  %p1113_p12 = pnand %p1112_p11, %p1106_p8 }
  0x1c   :  { %908 = vmatprep.subr.bf16.mxu1 %v1022_v10  ;;  %v1037_v25 = vld [vmem:[#allocation2 + $0x30] sm:$0xff]   ;;  %v1041_v29 = vld [vmem:[#allocation2 + $0x38] sm:$0xff]   ;;  %v36_v31 = vld [vmem:[%s1253_s0] sm:$0xff] }
  0x1d   :  { %887 = vmatpush3.bf16.msra.mxu0 %v1021_v9  ;;  %v1038_v26 = vld [vmem:[#allocation2 + $0xf0] sm:$0xff]   ;;  %v1042_v30 = vld [vmem:[#allocation2 + $0xf8] sm:$0xff]   ;;  %v810_v32 = vcombine.low %v36_v31, %v36_v31  ;;  %v811_v33 = vcombine.high %v36_v31, %v36_v31  ;;  %v1046_v35 = vld [vmem:[#allocation2 + $0x140] sm:$0xff]  }
  0x1e   :  { %888 = vmatprep.subr.bf16.mxu0 %v1024_v12  ;;  %v1039_v27 = vld [vmem:[#allocation2 + $0xb0] sm:$0xff]   ;;  %v1045_v34 = vld [vmem:[#allocation2 + $0xb8] sm:$0xff]   ;;  %v37_v36 = vld [vmem:[%s1253_s0 + $0x8] sm:$0xff] }
  0x1f   :  { %909 = vmatpush3.bf16.msra.mxu1 %v1023_v11  ;;  %552 = vmatprep.mubr.bf16.mxu0 %v811_v33  ;;  %v812_v37 = vcombine.low %v37_v36, %v37_v36  ;;  %v813_v38 = vcombine.high %v37_v36, %v37_v36  ;;  %v1049_v39 = vld [vmem:[#allocation2 + $0x100] sm:$0xff]   ;;  %v1051_v41 = vld [vmem:[#allocation2 + $0x148] sm:$0xff]   ;;  %v1054_v45 = vld [vmem:[#allocation2 + $0x150] sm:$0xff]  }
  0x20   :  { %910 = vmatprep.subr.bf16.mxu1 %v1026_v14  ;;  %v1050_v40 = vld [vmem:[#allocation2 + $0x180] sm:$0xff]   ;;  %v1052_v43 = vld [vmem:[#allocation2 + $0x108] sm:$0xff]   ;;  %v1055_v46 = vld [vmem:[#allocation2 + $0x110] sm:$0xff]  }
  0x21   :  { %889 = vmatpush3.bf16.msra.mxu0 %v1025_v13  ;;  %592 = vmatprep.mubr.bf16.mxu1 %v813_v38  ;;  %v1053_v44 = vld [vmem:[#allocation2 + $0x188] sm:$0xff]   ;;  %v1056_v47 = vld [vmem:[#allocation2 + $0x190] sm:$0xff]   ;;  %v1057_v48 = vld [vmem:[#allocation2 + $0x158] sm:$0xff]  }
  0x22   :  { %890 = vmatprep.subr.bf16.mxu0 %v1028_v16  ;;  %v1058_v49 = vld [vmem:[#allocation2 + $0x118] sm:$0xff]   ;;  %v1060_v50 = vld [vmem:[#allocation2 + $0x160] sm:$0xff]   ;;  %v1063_v53 = vld [vmem:[#allocation2 + $0x168] sm:$0xff]  }
  0x23   :  { %911 = vmatpush3.bf16.msra.mxu1 %v1027_v15  ;;  %v1059_v51 = vld [vmem:[#allocation2 + $0x198] sm:$0xff]   ;;  %v1061_v52 = vld [vmem:[#allocation2 + $0x120] sm:$0xff]   ;;  %v1064_v55 = vld [vmem:[#allocation2 + $0x128] sm:$0xff]  }
  0x24   :  { %912 = vmatprep.subr.bf16.mxu1 %v1030_v18  ;;  %v1062_v54 = vld [vmem:[#allocation2 + $0x1a0] sm:$0xff]   ;;  %v1066_v56 = vld [vmem:[#allocation2 + $0x170] sm:$0xff]   ;;  %v1065_v57 = vld [vmem:[#allocation2 + $0x1a8] sm:$0xff]  }
  0x25   :  { %891 = vmatpush3.bf16.msra.mxu0 %v1029_v17  ;;  %v1067_v58 = vld [vmem:[#allocation2 + $0x130] sm:$0xff]   ;;  %v1069_v62 = vld [vmem:[#allocation2 + $0x178] sm:$0xff]   ;;  %v1075_v3 = vld [vmem:[%s1256_s3] sm:$0xff]  }
  0x26   :  { %892 = vmatprep.subr.bf16.mxu0 %v1032_v20  ;;  %v38_v59 = vld [vmem:[%s1253_s0 + $0x10] sm:$0xff]  ;;  %v1070_v63 = vld [vmem:[#allocation2 + $0x138] sm:$0xff]   ;;  %v1076_v4 = vld [vmem:[%s1256_s3 + $0x8] sm:$0xff]  }
  0x27   :  { %913 = vmatpush3.bf16.msra.mxu1 %v1031_v19  ;;  %v1068_v60 = vld [vmem:[#allocation2 + $0x1b0] sm:$0xff]   ;;  %v815_v61 = vcombine.high %v38_v59, %v38_v59  ;;  %v1073_v0 = vld [vmem:[#allocation2 + $0x1b8] sm:$0xff]   ;;  %v814_v1 = vcombine.low %v38_v59, %v38_v59  ;;  %v1079_v7 = vld [vmem:[%s1256_s3 + $0x20] sm:$0xff]  }
  0x28   :  { %914 = vmatprep.subr.bf16.mxu1 %v1034_v22  ;;  %v1074_v2 = vld [vmem:[%s1253_s0 + $0x18] ss:$0 sps:$4 sm:$0xff]   ;;  %v1077_v5 = vld [vmem:[%s1256_s3 + $0x10] sm:$0xff]   ;;  %v1080_v8 = vld [vmem:[%s1256_s3 + $0x28] sm:$0xff]  }
  0x29   :  { %893 = vmatpush3.bf16.msra.mxu0 %v1033_v21  ;;  %v1078_v6 = vld [vmem:[%s1256_s3 + $0x18] sm:$0xff]   ;;  %v1081_v9 = vld [vmem:[%s1256_s3 + $0x30] sm:$0xff]   ;;  %v809_v12 = vld [vmem:[%s1255_s2] ss:$0 sm:$0xff] }
  0x2a   :  { %894 = vmatprep.subr.bf16.mxu0 %v1036_v24  ;;  %v1082_v10 = vld [vmem:[%s1256_s3 + $0x38] sm:$0xff]  }
  0x2b   :  { %915 = vmatpush3.bf16.msra.mxu1 %v1035_v23 }
  0x2c   :  { %916 = vmatprep.subr.bf16.mxu1 %v1038_v26 }
  0x2d   :  { %895 = vmatpush3.bf16.msra.mxu0 %v1037_v25 }
  0x2e   :  { %896 = vmatprep.subr.bf16.mxu0 %v1040_v28 }
  0x2f   :  { %917 = vmatpush3.bf16.msra.mxu1 %v1039_v27 }
  0x30   :  { %918 = vmatprep.subr.bf16.mxu1 %v1042_v30 }
  0x31   :  { %897 = vmatpush3.bf16.msra.mxu0 %v1041_v29 }
  0x32   :  { %926 = vmatprep.subr.bf16.mxu0 %v1046_v35 }
  0x33   :  { %919 = vmatpush3.bf16.msra.mxu1 %v1045_v34 }
  0x34   :  { %553 = vmatmul.mubr.bf16.vlgmr.msra.gmra.mrb[0].mxu0 %v810_v32  ;;  %966 = vmatprep.subr.bf16.mxu1 %v1134_v42 }
  0x35   :  { %927 = vmatpush3.bf16.msra.mxu0 %v1049_v39  ;;  %632 = vmatprep.mubr.bf16.mxu0 %v815_v61 }
  0x36   :  { %593 = vmatmul.mubr.bf16.vlgmr.msra.gmra.mrb[0].mxu1 %v812_v37  ;;  %928 = vmatprep.subr.bf16.mxu0 %v1051_v41  ;;  %v873_v37 = vld [vmem:[%s1257_s4] ss:$0 sm:$0xff] }
  0x37   :  { %967 = vmatpush3.bf16.msra.mxu1 %v1050_v40  ;;  %982 = vmatprep.mubr.msk.bf16.mxu1 %vm1135_vm0, %v1134_v42 }
  0x38   :  { %968 = vmatprep.subr.bf16.mxu1 %v1134_v42 }
  0x39   :  { %929 = vmatpush3.bf16.msra.mxu0 %v1052_v43 }
  0x3a   :  { %930 = vmatprep.subr.bf16.mxu0 %v1054_v45 }
  0x3b   :  { %969 = vmatpush3.bf16.msra.mxu1 %v1053_v44 }
  0x3c   :  { %970 = vmatprep.subr.bf16.mxu1 %v1134_v42 }
  0x3d   :  { %931 = vmatpush3.bf16.msra.mxu0 %v1055_v46 }
  0x3e   :  { %932 = vmatprep.subr.bf16.mxu0 %v1057_v48 }
  0x3f   :  { %971 = vmatpush3.bf16.msra.mxu1 %v1056_v47 }
  0x40   :  { %972 = vmatprep.subr.bf16.mxu1 %v1134_v42 }
  0x41   :  { %933 = vmatpush3.bf16.msra.mxu0 %v1058_v49 }
  0x42   :  { %934 = vmatprep.subr.bf16.mxu0 %v1060_v50 }
  0x43   :  { %973 = vmatpush3.bf16.msra.mxu1 %v1059_v51 }
  0x44   :  { %974 = vmatprep.subr.bf16.mxu1 %v1134_v42 }
  0x45   :  { %935 = vmatpush3.bf16.msra.mxu0 %v1061_v52 }
  0x46   :  { %936 = vmatprep.subr.bf16.mxu0 %v1063_v53 }
  0x47   :  { %975 = vmatpush3.bf16.msra.mxu1 %v1062_v54 }
  0x48   :  { %976 = vmatprep.subr.bf16.mxu1 %v1134_v42 }
  0x49   :  { %937 = vmatpush3.bf16.msra.mxu0 %v1064_v55 }
  0x4a   :  { %938 = vmatprep.subr.bf16.mxu0 %v1066_v56 }
  0x4b   :  { %977 = vmatpush3.bf16.msra.mxu1 %v1065_v57 }
  0x4c   :  { %978 = vmatprep.subr.bf16.mxu1 %v1134_v42 }
  0x4d   :  { %939 = vmatpush3.bf16.msra.mxu0 %v1067_v58 }
  0x4e   :  { %940 = vmatprep.subr.bf16.mxu0 %v1069_v62 }
  0x4f   :  { %979 = vmatpush3.bf16.msra.mxu1 %v1068_v60 }
  0x50   :  { %980 = vmatprep.subr.bf16.mxu1 %v1134_v42 }
  0x51   :  { %941 = vmatpush3.bf16.msra.mxu0 %v1070_v63 }
  0x52   :  { %986 = vmatprep.subr.bf16.mxu0 %v1134_v42 }
  0x53   :  { %981 = vmatpush3.bf16.msra.mxu1 %v1073_v0 }
  0x54   :  { %633 = vmatmul.mubr.bf16.vlgmr.msra.gmra.mrb[4].mxu0 %v814_v1 }
  0x55   :  { %1002 = vmatprep.mubr.msk.bf16.mxu0 %vm1135_vm0, %v1134_v42  ;;  %987 = vmatpush3.bf16.msra.mxu0 %v1075_v3 }
  0x56   :  { %983 = vmatmul.mubr.bf16.vlgmr.msra.gmra.mrb[4].mxu1 %v1074_v2  ;;  %988 = vmatprep.subr.bf16.mxu0 %v1134_v42 }
  0x59   :  { %989 = vmatpush3.bf16.msra.mxu0 %v1076_v4 }
  0x5a   :  { %990 = vmatprep.subr.bf16.mxu0 %v1134_v42 }
  0x5d   :  { %991 = vmatpush3.bf16.msra.mxu0 %v1077_v5 }
  0x5e   :  { %992 = vmatprep.subr.bf16.mxu0 %v1134_v42 }
  0x61   :  { %993 = vmatpush3.bf16.msra.mxu0 %v1078_v6 }
  0x62   :  { %994 = vmatprep.subr.bf16.mxu0 %v1134_v42 }
  0x65   :  { %995 = vmatpush3.bf16.msra.mxu0 %v1079_v7 }
  0x66   :  { %996 = vmatprep.subr.bf16.mxu0 %v1134_v42 }
  0x69   :  { %997 = vmatpush3.bf16.msra.mxu0 %v1080_v8 }
  0x6a   :  { %998 = vmatprep.subr.bf16.mxu0 %v1134_v42 }
  0x6d   :  { %999 = vmatpush3.bf16.msra.mxu0 %v1081_v9 }
  0x6e   :  { %1000 = vmatprep.subr.bf16.mxu0 %v1134_v42 }
  0x71   :  { %1001 = vmatpush3.bf16.msra.mxu0 %v1082_v10 }
 0x107   :  { %v898_v11 = vpop.f32.mrb[0].mxu0 }
 0x108   :  { %v899_v13 = vpop.f32.mrb[1].mxu0 }
 0x109   :  { %v900_v14 = vadd.f32 %v899_v13, %v898_v11  ;;  %v901_v15 = vpop.f32.mrb[2].mxu0  ;;  %v920_v16 = vpop.f32.mrb[0].mxu1 }
 0x10a   :  { %v902_v17 = vpop.f32.mrb[3].mxu0  ;;  %v921_v18 = vpop.f32.mrb[1].mxu1 }
 0x10b   :  { %v555_v19 = vadd.f32 %v900_v14, %v809_v12  ;;  %v922_v20 = vadd.f32 %v921_v18, %v920_v16  ;;  %v923_v21 = vpop.f32.mrb[2].mxu1 }
 0x10c   :  { %v924_v22 = vpop.f32.mrb[3].mxu1 }
 0x10d   :  { %v595_v23 = vadd.f32 %v922_v20, %v555_v19 }
 0x127   :  { %v942_v24 = vpop.f32.mrb[4].mxu0 }
 0x128   :  { %v943_v25 = vpop.f32.mrb[5].mxu0 }
 0x129   :  { %v944_v26 = vadd.f32 %v943_v25, %v942_v24  ;;  %v945_v27 = vpop.f32.mrb[6].mxu0  ;;  %v674_v28 = vpop.f32.mrb[4].mxu1 }
 0x12a   :  { %v946_v29 = vpop.f32.mrb[7].mxu0  ;;  %v984_v30 = vpop.f32.mrb[5].mxu1 }
 0x12b   :  { %v635_v31 = vadd.f32 %v944_v26, %v595_v23  ;;  %v677_v32 = vpop.f32.mrb[6].mxu1 }
 0x12c   :  { %v985_v33 = vpop.f32.mrb[7].mxu1 }
 0x12d   :  { %v675_v34 = vadd.f32 %v674_v28, %v635_v31 }
 0x12f   :  { %v680_v35 = vmax.f32 %v675_v34, 0.0 }
 0x131   :  { %v681_v36 = vpack.c.bf16 %v680_v35, %v680_v35 }
 0x133   :  { %1003 = vmatmul.mubr.bf16.vlgmr.msra.gmra.mrb[8].mxu0 %v681_v36 }
 0x206   :  { %v787_v38 = vpop.f32.mrb[8].mxu0 }
 0x207   :  { %v788_v39 = vadd.f32 %v873_v37, %v787_v38  ;;  %v1004_v40 = vpop.f32.mrb[9].mxu0 }
 0x208   :  { %v790_v41 = vpop.f32.mrb[10].mxu0 }
 0x209   :  { %793 = vst [vmem:[#allocation5] sm:$0xff] %v788_v39  ;;  %v1005_v42 = vpop.f32.mrb[11].mxu0 }
 0x20a   :  { %1116 = shalt.err (!%p1113_p12)
}
 0x20b   :  { %s1117_s4 = scalar_lea.hbm %s1258_s5, 128 }
 0x20c   :  { %p1118_p13 = scmp.ne.s32.totalorder %s1258_s5, %s1117_s4  ;;  %p1121_p0 = scmp.lt.u32.totalorder %s1117_s4, %s1258_s5 }
 0x20e   :  { %p1123_p1 = pnand %p1121_p0, %p1118_p13 }
 0x210   :  { %1126 = shalt.err (!%p1123_p1)
}
 0x211   :  { %803 = dma.vmem_to_hbm [thread:$0]  %s801_s1, 128, %s1258_s5, [#allocation4]  }
 0x212   :  { %1129 = dma.done.wait [#allocation4], 128  }
 0x213   :  { %1130 = vsyncadd [#allocation4], 4294967168 }
 0x214   :  { %807 = vsyncpa [#allocation3], 1 }
 0x215   :  { %808 = vsyncpa [#allocation4], 1 }

</bundles_post_ra>
